<compile_context>
chip_gen: v7x
topology: tpu7x:2x2x1
jax: 0.10.0
libtpu: 0.0.40
codegen_flags: <defaults>
</compile_context>

<pallas_src>
import numpy as np
import jax
import jax.numpy as jnp
from jax.experimental import pallas as pl
from jax.experimental.pallas import tpu as pltpu

# ----- sizes (small, synthetic SMPL) -----
B = 2                    # batch
V = 256                  # vertices (lane axis)
NJ = 24                  # joints
NB = 10                  # shape betas
P = (NJ - 1) * 9         # pose-feature size = 207
KPAD = 256               # padded width of [betas | pose_feat | 1 | zeros]
NJP = 128                # lane-padded joint axis for kernel output
BC = B * 3               # batch*channel rows
BCP = -(-BC // 8) * 8    # sublane-padded row count (8 for B=2)

SMPL_PARENTS = [-1, 0, 0, 0, 1, 2, 3, 4, 5, 6, 7, 8, 9, 9, 9, 12, 13, 14,
                16, 17, 18, 19, 20, 21]
_PARENTS_NP = np.asarray(SMPL_PARENTS)


def _compute_levels(parents):
    """Group joints by tree depth; each level is a contiguous [start, end) range."""
    depth = np.zeros(len(parents), np.int64)
    for i in range(1, len(parents)):
        depth[i] = depth[parents[i]] + 1
    levels = []
    for d in range(1, int(depth.max()) + 1):
        idx = np.nonzero(depth == d)[0]
        assert np.all(np.diff(idx) == 1), "SMPL level indices assumed contiguous"
        levels.append((int(idx[0]), int(idx[-1]) + 1))
    return levels


_LEVELS = _compute_levels(_PARENTS_NP)


# ---------------------------------------------------------------------------
# Fused Pallas kernel: blendshapes + LBS skinning + posed-joint regression
# ---------------------------------------------------------------------------
def _smpl_fused_kernel(bp_ref, blend_ref, a_ref, trans_ref, w_ref, jregT_ref,
                       out_ref):
    # bp_ref:    (BCP, KPAD)   f32  rows b*3+c = [betas | pose_feat | 1 | 0]; pad rows 0
    # blend_ref: (KPAD, 3V)    bf16 [shapedirs ; posedirs ; v_template ; zeros], col = k*V+v
    # a_ref:     (4*BCP, NJ)   f32  row k*BCP + b*3 + c = A34[b, :, c, k]; pad rows 0
    # trans_ref: (BCP, 1)      f32  row b*3+c = trans[b, c]
    # w_ref:     (NJ, V)       bf16 LBS weights, transposed
    # jregT_ref: (V, NJP)      bf16 joint regressor, transposed, lane-padded to 128
    # out_ref:   (BCP, NJP)    f32  row b*3+c = posed joints, channel c, batch b

    # Shape + pose blendshapes: one MXU matmul for all (batch, channel) rows.
    vposed = jnp.dot(bp_ref[...].astype(jnp.bfloat16), blend_ref[...],
                     preferred_element_type=jnp.float32)           # (BCP, 3V)

    # Per-vertex transform rows for all batches/channels/rotation-columns at once.
    T = jnp.dot(a_ref[...].astype(jnp.bfloat16), w_ref[...],
                preferred_element_type=jnp.float32)                # (4*BCP, V)

    # LBS apply: sublane-aligned 8-row slices of T, lane-aligned V slices of vposed.
    # All elementwise math stays in f32 (v5e has no bf16 VALU path).
    verts = (T[0 * BCP:1 * BCP] * vposed[:, 0 * V:1 * V]
             + T[1 * BCP:2 * BCP] * vposed[:, 1 * V:2 * V]
             + T[2 * BCP:3 * BCP] * vposed[:, 2 * V:3 * V]
             + T[3 * BCP:4 * BCP])                                  # (BCP, V)

    # Posed-joint regression (lane-dense NJP=128) + global translation broadcast,
    # written with a single full-ref (8, 128) store.
    joints = jnp.dot(verts.astype(jnp.bfloat16), jregT_ref[...],
                     preferred_element_type=jnp.float32)            # (BCP, NJP)
    out_ref[...] = joints + trans_ref[...]


def _fused_call(bp_rep, a_km, trans_flat, params):
    vmem = lambda: pl.BlockSpec(memory_space=pltpu.MemorySpace.VMEM)
    return pl.pallas_call(
        _smpl_fused_kernel,
        out_shape=jax.ShapeDtypeStruct((BCP, NJP), jnp.float32),
        in_specs=[vmem() for _ in range(6)],
        out_specs=vmem(),
    )(bp_rep, params["blend_dirs"], a_km, trans_flat,
      params["lbs_weights_T"], params["jregT_pad"])


# ---------------------------------------------------------------------------
# Plain-JAX glue: Rodrigues + depth-batched forward kinematics (tiny 4x4 math)
# TODO(synk): profile the whole jit — at this problem size the serial chain of
# tiny XLA ops here may rival the kernel; could be folded in via SMEM if so.
# ---------------------------------------------------------------------------
def _rodrigues(rot_vecs):
    # rot_vecs: (B, NJ, 3) -> (B, NJ, 3, 3)
    angle = jnp.sqrt(jnp.sum(rot_vecs * rot_vecs, axis=-1, keepdims=True) + 1e-16)
    rot_dir = rot_vecs / angle
    cos = jnp.cos(angle)[..., None]
    sin = jnp.sin(angle)[..., None]
    rx, ry, rz = rot_dir[..., 0], rot_dir[..., 1], rot_dir[..., 2]
    zeros = jnp.zeros_like(rx)
    K = jnp.stack([zeros, -rz, ry, rz, zeros, -rx, -ry, rx, zeros],
                  axis=-1).reshape(rot_vecs.shape[:-1] + (3, 3))
    ident = jnp.eye(3, dtype=rot_vecs.dtype)
    return ident + sin * K + (1.0 - cos) * jnp.matmul(K, K)


def _rigid_transform_levels(rot_mats, j_rest):
    """Forward kinematics batched by tree depth (8 levels instead of 23 matmuls).

    Returns global rotations (B,NJ,3,3) and skinning translations
    t_skin = t_global - R_global @ j_rest  (B,NJ,3) — the top-right column of the
    standard SMPL relative transforms (homogeneous bottom row never needed).
    """
    parents = _PARENTS_NP
    rel_t = jnp.concatenate(
        [j_rest[:, :1], j_rest[:, 1:] - j_rest[:, parents[1:]]], axis=1)  # (B,NJ,3)
    GR = rot_mats          # root entry already correct; others overwritten per level
    Gt = rel_t
    for (s, e) in _LEVELS:
        par = parents[s:e]
        pR = GR[:, par]                                            # (B,n,3,3)
        pt = Gt[:, par]                                            # (B,n,3)
        nR = jnp.matmul(pR, rot_mats[:, s:e])                      # (B,n,3,3)
        nt = jnp.einsum('bnij,bnj->bni', pR, rel_t[:, s:e]) + pt   # (B,n,3)
        GR = GR.at[:, s:e].set(nR)
        Gt = Gt.at[:, s:e].set(nt)
    t_skin = Gt - jnp.einsum('bjik,bjk->bji', GR, j_rest)          # (B,NJ,3)
    return GR, t_skin


# ---------------------------------------------------------------------------
# Parameters (synthetic SMPL) + packed kernel layouts
# ---------------------------------------------------------------------------
def init_smpl_params(key):
    k1, k2, k3, k4, k5 = jax.random.split(key, 5)
    v_template = jax.random.normal(k1, (3, V), jnp.float32) * 0.5
    shapedirs = jax.random.normal(k2, (3, NB, V), jnp.float32) * 0.03
    posedirs = jax.random.normal(k3, (3, P, V), jnp.float32) * 0.01
    jreg = jax.nn.softmax(jax.random.normal(k4, (NJ, V), jnp.float32), axis=-1)
    lbs_w = jax.nn.softmax(jax.random.normal(k5, (V, NJ), jnp.float32) * 2.0, axis=-1)

    # Packed blend matrix: rows = [shapedirs | posedirs | v_template | zeros],
    # columns laid out channel-major: col = c*V + v.
    sd_flat = jnp.transpose(shapedirs, (1, 0, 2)).reshape(NB, 3 * V)
    pd_flat = jnp.transpose(posedirs, (1, 0, 2)).reshape(P, 3 * V)
    vt_flat = v_template.reshape(1, 3 * V)
    pad = jnp.zeros((KPAD - NB - P - 1, 3 * V), jnp.float32)
    blend_dirs = jnp.concatenate([sd_flat, pd_flat, vt_flat, pad], axis=0)  # (KPAD,3V)

    # Joint-space blendshapes (J_regressor is linear): rest joints come straight
    # from betas, so the kinematic chain never depends on a kernel output.
    j_template = jnp.einsum('jv,cv->jc', jreg, v_template)                  # (NJ, 3)
    j_shapedirs = jnp.einsum('cnv,jv->njc', shapedirs, jreg).reshape(NB, NJ * 3)

    # Lane-padded transposed joint regressor for lane-dense kernel output.
    jregT_pad = jnp.pad(jnp.transpose(jreg), ((0, 0), (0, NJP - NJ)))       # (V, NJP)

    # Constants feeding the MXU are stored in bf16 (halves HBM->VMEM DMA);
    # accumulation stays f32 inside the kernel.  Validate vs f32 if reusing.
    return dict(blend_dirs=blend_dirs.astype(jnp.bfloat16),
                j_template=j_template,
                j_shapedirs=j_shapedirs,
                jregT_pad=jregT_pad.astype(jnp.bfloat16),
                lbs_weights_T=jnp.transpose(lbs_w).astype(jnp.bfloat16))    # (NJ, V)


# ---------------------------------------------------------------------------
# Decoder forward + Safe wrapper
# ---------------------------------------------------------------------------
def smpl_decode(params, betas, pose, trans, output_format="joints"):
    assert output_format == "joints"
    betas = betas.astype(jnp.float32)
    pose = pose.astype(jnp.float32)
    trans = trans.astype(jnp.float32)

    rot_mats = _rodrigues(pose.reshape(B, NJ, 3))                           # (B,NJ,3,3)
    pose_feat = (rot_mats[:, 1:] - jnp.eye(3, dtype=jnp.float32)).reshape(B, P)

    # Rest joints directly from betas via precomputed joint blendshapes.
    j_rest = params["j_template"] + (betas @ params["j_shapedirs"]).reshape(B, NJ, 3)

    # Forward kinematics, batched by tree depth.
    GR, t_skin = _rigid_transform_levels(rot_mats, j_rest)

    # k-major transform rows for the kernel: row k*BCP + b*3 + c = A34[b, :, c, k].
    A34 = jnp.concatenate([GR, t_skin[..., None]], axis=-1)                 # (B,NJ,3,4)
    a_km = jnp.transpose(A34, (3, 0, 2, 1)).reshape(4, BC, NJ)
    a_km = jnp.pad(a_km, ((0, 0), (0, BCP - BC), (0, 0))).reshape(4 * BCP, NJ)

    # Packed blend input [betas | pose_feat | 1 | zeros] (the 1 picks up v_template),
    # repeated 3x per batch row (one copy per output channel), sublane-padded to BCP.
    bp = jnp.concatenate(
        [betas, pose_feat, jnp.ones((B, 1), jnp.float32),
         jnp.zeros((B, KPAD - NB - P - 1), jnp.float32)], axis=1)           # (B, KPAD)
    bp_rep = jnp.broadcast_to(bp[:, None, :], (B, 3, KPAD)).reshape(BC, KPAD)
    bp_rep = jnp.pad(bp_rep, ((0, BCP - BC), (0, 0)))                       # (BCP, KPAD)

    trans_flat = jnp.pad(trans.reshape(BC, 1), ((0, BCP - BC), (0, 0)))     # (BCP, 1)

    joints_pad = _fused_call(bp_rep, a_km, trans_flat, params)              # (BCP, NJP)
    return jnp.transpose(joints_pad[:BC, :NJ].reshape(B, 3, NJ), (0, 2, 1)) # (B, NJ, 3)


class SafeSMPLDecoderJAX:
    """JAX analogue of SafeSMPLDecoder: device-sync of inputs is a no-op here."""
    # TODO(synk): PyTorch's `.cpu()` / `.to(device)` device bookkeeping has no Pallas
    # equivalent; inputs are simply consumed on the default (TPU) backend.

    def __init__(self, params):
        self.params = params
        self._decode = jax.jit(lambda b, p, t: smpl_decode(self.params, b, p, t))

    def __call__(self, betas, pose, trans, output_format="joints"):
        assert output_format == "joints"
        return self._decode(betas, pose, trans)


if __name__ == "__main__":
    key = jax.random.PRNGKey(0)
    kp, kb, kpose, kt = jax.random.split(key, 4)
    params = init_smpl_params(kp)

    betas = jax.random.normal(kb, (B, NB), jnp.float32)
    pose = jax.random.normal(kpose, (B, NJ * 3), jnp.float32) * 0.2
    trans = jax.random.normal(kt, (B, 3), jnp.float32)

    decoder = SafeSMPLDecoderJAX(params)
    joints = decoder(betas, pose, trans, output_format="joints")
    joints = jax.block_until_ready(joints)

    assert joints.shape == (B, NJ, 3)
    assert bool(jnp.all(jnp.isfinite(joints)))
    print("KERNEL_OK")
</pallas_src>

<mosaic_0001>
module attributes {stable_mosaic.version = 11 : i64} {
  func.func @_smpl_fused_kernel(%arg0: memref<8x256xf32, #tpu.memory_space<vmem>>, %arg1: memref<256x768xbf16, #tpu.memory_space<vmem>>, %arg2: memref<32x24xf32, #tpu.memory_space<vmem>>, %arg3: memref<8x1xf32, #tpu.memory_space<vmem>>, %arg4: memref<24x256xbf16, #tpu.memory_space<vmem>>, %arg5: memref<256x128xbf16, #tpu.memory_space<vmem>>, %arg6: memref<8x128xf32, #tpu.memory_space<vmem>>) attributes {dimension_semantics = [], scalar_prefetch = 0 : i64, scratch_operands = 0 : i64, tpu.core_type = #tpu.core_type<tc>} {
    %c0 = arith.constant 0 : index
    %c0_0 = arith.constant 0 : index
    %0 = vector.load %arg0[%c0, %c0_0] : memref<8x256xf32, #tpu.memory_space<vmem>>, vector<8x256xf32>
    %1 = arith.truncf %0 : vector<8x256xf32> to vector<8x256xbf16>
    %c0_1 = arith.constant 0 : index
    %c0_2 = arith.constant 0 : index
    %2 = vector.load %arg1[%c0_1, %c0_2] : memref<256x768xbf16, #tpu.memory_space<vmem>>, vector<256x768xbf16>
    %cst = arith.constant dense<0.000000e+00> : vector<8x768xf32>
    %3 = tpu.matmul %1, %2, %cst {dimension_numbers = #tpu.dot_dimension_numbers<[1], [0], [0], [1], [0, 0, 1, 1], [], []>} : vector<8x256xbf16>, vector<256x768xbf16>, vector<8x768xf32> -> vector<8x768xf32>
    %c0_3 = arith.constant 0 : index
    %c0_4 = arith.constant 0 : index
    %4 = vector.load %arg2[%c0_3, %c0_4] : memref<32x24xf32, #tpu.memory_space<vmem>>, vector<32x24xf32>
    %5 = arith.truncf %4 : vector<32x24xf32> to vector<32x24xbf16>
    %c0_5 = arith.constant 0 : index
    %c0_6 = arith.constant 0 : index
    %6 = vector.load %arg4[%c0_5, %c0_6] : memref<24x256xbf16, #tpu.memory_space<vmem>>, vector<24x256xbf16>
    %cst_7 = arith.constant dense<0.000000e+00> : vector<32x256xf32>
    %7 = tpu.matmul %5, %6, %cst_7 {dimension_numbers = #tpu.dot_dimension_numbers<[1], [0], [0], [1], [0, 0, 1, 1], [], []>} : vector<32x24xbf16>, vector<24x256xbf16>, vector<32x256xf32> -> vector<32x256xf32>
    %8 = vector.extract_strided_slice %7 {offsets = [0, 0], sizes = [8, 256], strides = [1, 1]} : vector<32x256xf32> to vector<8x256xf32>
    %9 = vector.extract_strided_slice %3 {offsets = [0, 0], sizes = [8, 256], strides = [1, 1]} : vector<8x768xf32> to vector<8x256xf32>
    %10 = arith.mulf %8, %9 : vector<8x256xf32>
    %11 = vector.extract_strided_slice %7 {offsets = [8, 0], sizes = [8, 256], strides = [1, 1]} : vector<32x256xf32> to vector<8x256xf32>
    %12 = vector.extract_strided_slice %3 {offsets = [0, 256], sizes = [8, 256], strides = [1, 1]} : vector<8x768xf32> to vector<8x256xf32>
    %13 = arith.mulf %11, %12 : vector<8x256xf32>
    %14 = arith.addf %10, %13 : vector<8x256xf32>
    %15 = vector.extract_strided_slice %7 {offsets = [16, 0], sizes = [8, 256], strides = [1, 1]} : vector<32x256xf32> to vector<8x256xf32>
    %16 = vector.extract_strided_slice %3 {offsets = [0, 512], sizes = [8, 256], strides = [1, 1]} : vector<8x768xf32> to vector<8x256xf32>
    %17 = arith.mulf %15, %16 : vector<8x256xf32>
    %18 = arith.addf %14, %17 : vector<8x256xf32>
    %19 = vector.extract_strided_slice %7 {offsets = [24, 0], sizes = [8, 256], strides = [1, 1]} : vector<32x256xf32> to vector<8x256xf32>
    %20 = arith.addf %18, %19 : vector<8x256xf32>
    %21 = arith.truncf %20 : vector<8x256xf32> to vector<8x256xbf16>
    %c0_8 = arith.constant 0 : index
    %c0_9 = arith.constant 0 : index
    %22 = vector.load %arg5[%c0_8, %c0_9] : memref<256x128xbf16, #tpu.memory_space<vmem>>, vector<256x128xbf16>
    %cst_10 = arith.constant dense<0.000000e+00> : vector<8x128xf32>
    %23 = tpu.matmul %21, %22, %cst_10 {dimension_numbers = #tpu.dot_dimension_numbers<[1], [0], [0], [1], [0, 0, 1, 1], [], []>} : vector<8x256xbf16>, vector<256x128xbf16>, vector<8x128xf32> -> vector<8x128xf32>
    %c0_11 = arith.constant 0 : index
    %c0_12 = arith.constant 0 : index
    %24 = vector.load %arg3[%c0_11, %c0_12] : memref<8x1xf32, #tpu.memory_space<vmem>>, vector<8x1xf32>
    %25 = vector.broadcast %24 : vector<8x1xf32> to vector<8x128xf32>
    %26 = arith.addf %23, %25 : vector<8x128xf32>
    %c0_13 = arith.constant 0 : index
    %c0_14 = arith.constant 0 : index
    %27 = vector.load %arg6[%c0_13, %c0_14] : memref<8x128xf32, #tpu.memory_space<vmem>>, vector<8x128xf32>
    tpu.vector_store %arg6[%c0_13, %c0_14], %26 {strides = array<i32>} : memref<8x128xf32, #tpu.memory_space<vmem>>, vector<8x128xf32>,
    return
  }
}

</mosaic_0001>

<bundles_post_ra>
// kernel: _lambda_.1
= control target key start
LH: loop header
LB: loop body
LE: loop exit
PB: predicated region body
PF: predicated region fallthrough
CT: control target
= control target key end

     0   :  { %v1319_v1 = vmov 0   ;;  %vm758_vm0 = vcmask 1043456   ;;  %vm751_vm1 = vcmask 195584   ;;  %s1739_s1 = inlined_call_operand.vmem [shape: bf16[256,768], index: 1, kind: input, shape index: {}]   ;;  %s1740_s0 = inlined_call_operand.vmem [shape: f32[8,256], index: 0, kind: input, shape index: {}]   ;;  %s1741_s4 = inlined_call_operand.vmem [shape: bf16[24,256], index: 4, kind: input, shape index: {}]   ;;  %s1742_s2 = inlined_call_operand.vmem [shape: f32[32,24], index: 2, kind: input, shape index: {}]   ;;  %s1743_s5 = inlined_call_operand.vmem [shape: bf16[256,128], index: 5, kind: input, shape index: {}]   ;;  %s1744_s3 = inlined_call_operand.vmem [shape: f32[8,1], index: 3, kind: input, shape index: {}]   ;;  %s1745_s6 = inlined_call_operand.vmem [shape: f32[8,128], index: 6, kind: output, shape index: {}]  }
   0x1   :  { %v1154_v0 = vld [vmem:[%s1739_s1 + $0x4] ss:$24 sps:$4 sm:$0xff]   ;;  %1153 = vset.pattern.permute.xlu0 %v1319_v1  ;;  %v1158_v3 = vld [vmem:[%s1739_s1] ss:$24 sps:$4 sm:$0xff]   ;;  %v1160_v5 = vld [vmem:[%s1739_s1 + $0x34] ss:$24 sps:$4 sm:$0xff]  }
   0x2   :  { %v1156_v2 = vld [vmem:[%s1739_s1 + $0xc] ss:$24 sps:$4 sm:$0xff]   ;;  %604 = vmatprep.subr.bf16.mxu0 %v1154_v0  ;;  %v1159_v4 = vld [vmem:[%s1739_s1 + $0x8] ss:$24 sps:$4 sm:$0xff]   ;;  %v1162_v6 = vld [vmem:[%s1739_s1 + $0x3c] ss:$24 sps:$4 sm:$0xff]  }
   0x3   :  { %645 = vmatprep.subr.bf16.mxu1 %v1156_v2  ;;  %605 = vmatpush1.bf16.msra.mxu0 %v1158_v3  ;;  %v1164_v7 = vld [vmem:[%s1739_s1 + $0x30] ss:$24 sps:$4 sm:$0xff]   ;;  %v1166_v9 = vld [vmem:[%s1739_s1 + $0x64] ss:$24 sps:$4 sm:$0xff]   ;;  %v1170_v11 = vld [vmem:[%s1739_s1 + $0x60] ss:$24 sps:$4 sm:$0xff]  }
   0x4   :  { %646 = vmatpush1.bf16.msra.mxu1 %v1159_v4  ;;  %606 = vmatprep.subr.bf16.mxu0 %v1160_v5  ;;  %v1165_v8 = vld [vmem:[%s1739_s1 + $0x38] ss:$24 sps:$4 sm:$0xff]   ;;  %v1168_v10 = vld [vmem:[%s1739_s1 + $0x6c] ss:$24 sps:$4 sm:$0xff]   ;;  %v1171_v12 = vld [vmem:[%s1739_s1 + $0x68] ss:$24 sps:$4 sm:$0xff]  }
   0x5   :  { %647 = vmatprep.subr.bf16.mxu1 %v1162_v6  ;;  %v1172_v13 = vld [vmem:[%s1739_s1 + $0x94] ss:$24 sps:$4 sm:$0xff]   ;;  %v1176_v15 = vld [vmem:[%s1739_s1 + $0x90] ss:$24 sps:$4 sm:$0xff]   ;;  %v1178_v17 = vld [vmem:[%s1739_s1 + $0xc4] ss:$24 sps:$4 sm:$0xff]  }
   0x6   :  { %v1174_v14 = vld [vmem:[%s1739_s1 + $0x9c] ss:$24 sps:$4 sm:$0xff]   ;;  %v1177_v16 = vld [vmem:[%s1739_s1 + $0x98] ss:$24 sps:$4 sm:$0xff]   ;;  %v1180_v18 = vld [vmem:[%s1739_s1 + $0xcc] ss:$24 sps:$4 sm:$0xff]  }
   0x7   :  { %607 = vmatpush1.bf16.msra.mxu0 %v1164_v7  ;;  %v1182_v19 = vld [vmem:[%s1739_s1 + $0xc0] ss:$24 sps:$4 sm:$0xff]   ;;  %v1184_v21 = vld [vmem:[%s1739_s1 + $0xf4] ss:$24 sps:$4 sm:$0xff]   ;;  %v1188_v23 = vld [vmem:[%s1739_s1 + $0xf0] ss:$24 sps:$4 sm:$0xff]  }
   0x8   :  { %648 = vmatpush1.bf16.msra.mxu1 %v1165_v8  ;;  %608 = vmatprep.subr.bf16.mxu0 %v1166_v9  ;;  %v1183_v20 = vld [vmem:[%s1739_s1 + $0xc8] ss:$24 sps:$4 sm:$0xff]   ;;  %v1186_v22 = vld [vmem:[%s1739_s1 + $0xfc] ss:$24 sps:$4 sm:$0xff]   ;;  %v1189_v24 = vld [vmem:[%s1739_s1 + $0xf8] ss:$24 sps:$4 sm:$0xff]  }
   0x9   :  { %649 = vmatprep.subr.bf16.mxu1 %v1168_v10  ;;  %v1190_v25 = vld [vmem:[%s1739_s1 + $0x124] ss:$24 sps:$4 sm:$0xff]   ;;  %v1194_v27 = vld [vmem:[%s1739_s1 + $0x120] ss:$24 sps:$4 sm:$0xff]   ;;  %v1196_v29 = vld [vmem:[%s1739_s1 + $0x154] ss:$24 sps:$4 sm:$0xff]  }
   0xa   :  { %v1192_v26 = vld [vmem:[%s1739_s1 + $0x12c] ss:$24 sps:$4 sm:$0xff]   ;;  %v1195_v28 = vld [vmem:[%s1739_s1 + $0x128] ss:$24 sps:$4 sm:$0xff]   ;;  %v1198_v30 = vld [vmem:[%s1739_s1 + $0x15c] ss:$24 sps:$4 sm:$0xff]  }
   0xb   :  { %609 = vmatpush1.bf16.msra.mxu0 %v1170_v11  ;;  %v1200_v31 = vld [vmem:[%s1739_s1 + $0x150] ss:$24 sps:$4 sm:$0xff]   ;;  %v1202_v33 = vld [vmem:[%s1739_s1 + $0x184] ss:$24 sps:$4 sm:$0xff]   ;;  %v1206_v35 = vld [vmem:[%s1739_s1 + $0x180] ss:$24 sps:$4 sm:$0xff]  }
   0xc   :  { %650 = vmatpush1.bf16.msra.mxu1 %v1171_v12  ;;  %610 = vmatprep.subr.bf16.mxu0 %v1172_v13  ;;  %v1201_v32 = vld [vmem:[%s1739_s1 + $0x158] ss:$24 sps:$4 sm:$0xff]   ;;  %v1204_v34 = vld [vmem:[%s1739_s1 + $0x18c] ss:$24 sps:$4 sm:$0xff]   ;;  %v1207_v36 = vld [vmem:[%s1739_s1 + $0x188] ss:$24 sps:$4 sm:$0xff]  }
   0xd   :  { %651 = vmatprep.subr.bf16.mxu1 %v1174_v14  ;;  %v1208_v37 = vld [vmem:[%s1739_s1 + $0x1b4] ss:$24 sps:$4 sm:$0xff]   ;;  %v1212_v39 = vld [vmem:[%s1739_s1 + $0x1b0] ss:$24 sps:$4 sm:$0xff]   ;;  %v1214_v41 = vld [vmem:[%s1739_s1 + $0x1e4] ss:$24 sps:$4 sm:$0xff]  }
   0xe   :  { %v1210_v38 = vld [vmem:[%s1739_s1 + $0x1bc] ss:$24 sps:$4 sm:$0xff]   ;;  %v1213_v40 = vld [vmem:[%s1739_s1 + $0x1b8] ss:$24 sps:$4 sm:$0xff]   ;;  %v1216_v42 = vld [vmem:[%s1739_s1 + $0x1ec] ss:$24 sps:$4 sm:$0xff]  }
   0xf   :  { %611 = vmatpush1.bf16.msra.mxu0 %v1176_v15  ;;  %v1218_v43 = vld [vmem:[%s1739_s1 + $0x1e0] ss:$24 sps:$4 sm:$0xff]   ;;  %v1220_v45 = vld [vmem:[%s1739_s1 + $0x214] ss:$24 sps:$4 sm:$0xff]   ;;  %v1224_v49 = vld [vmem:[%s1739_s1 + $0x210] ss:$24 sps:$4 sm:$0xff]  }
  0x10   :  { %652 = vmatpush1.bf16.msra.mxu1 %v1177_v16  ;;  %612 = vmatprep.subr.bf16.mxu0 %v1178_v17  ;;  %v1219_v44 = vld [vmem:[%s1739_s1 + $0x1e8] ss:$24 sps:$4 sm:$0xff]   ;;  %v1222_v46 = vld [vmem:[%s1739_s1 + $0x21c] ss:$24 sps:$4 sm:$0xff]   ;;  %v1225_v50 = vld [vmem:[%s1739_s1 + $0x218] ss:$24 sps:$4 sm:$0xff]  }
  0x11   :  { %653 = vmatprep.subr.bf16.mxu1 %v1180_v18  ;;  %v25_v47 = vld [vmem:[%s1740_s0 + $0x8] sm:$0xff]  ;;  %v1226_v51 = vld [vmem:[%s1739_s1 + $0x244] ss:$24 sps:$4 sm:$0xff]   ;;  %v1230_v53 = vld [vmem:[%s1739_s1 + $0x240] ss:$24 sps:$4 sm:$0xff]  }
  0x12   :  { %v1497_v48 = vpack.c.bf16 %v25_v47, %v25_v47  ;;  %v1228_v52 = vld [vmem:[%s1739_s1 + $0x24c] ss:$24 sps:$4 sm:$0xff]   ;;  %v1231_v54 = vld [vmem:[%s1739_s1 + $0x248] ss:$24 sps:$4 sm:$0xff]   ;;  %v1234_v56 = vld [vmem:[%s1739_s1 + $0x27c] ss:$24 sps:$4 sm:$0xff]  }
  0x13   :  { %613 = vmatpush1.bf16.msra.mxu0 %v1182_v19  ;;  %v1232_v55 = vld [vmem:[%s1739_s1 + $0x274] ss:$24 sps:$4 sm:$0xff]   ;;  %v1236_v57 = vld [vmem:[%s1739_s1 + $0x270] ss:$24 sps:$4 sm:$0xff]   ;;  %v1238_v59 = vld [vmem:[%s1739_s1 + $0x2a4] ss:$24 sps:$4 sm:$0xff]  }
  0x14   :  { %654 = vmatpush1.bf16.msra.mxu1 %v1183_v20  ;;  %614 = vmatprep.subr.bf16.mxu0 %v1184_v21  ;;  %v1237_v58 = vld [vmem:[%s1739_s1 + $0x278] ss:$24 sps:$4 sm:$0xff]   ;;  %v1240_v60 = vld [vmem:[%s1739_s1 + $0x2ac] ss:$24 sps:$4 sm:$0xff]   ;;  %v1243_v62 = vld [vmem:[%s1739_s1 + $0x2a8] ss:$24 sps:$4 sm:$0xff]  }
  0x15   :  { %655 = vmatprep.subr.bf16.mxu1 %v1186_v22  ;;  %636 = vmatprep.mubr.bf16.mxu0 %v1497_v48  ;;  %v1242_v61 = vld [vmem:[%s1739_s1 + $0x2a0] ss:$24 sps:$4 sm:$0xff]   ;;  %v1244_v63 = vld [vmem:[%s1739_s1 + $0x2d4] ss:$24 sps:$4 sm:$0xff]   ;;  %v1248_v2 = vld [vmem:[%s1739_s1 + $0x2d0] ss:$24 sps:$4 sm:$0xff]  }
  0x16   :  { %677 = vmatprep.mubr.bf16.mxu1 %v1497_v48  ;;  %v1246_v0 = vld [vmem:[%s1739_s1 + $0x2dc] ss:$24 sps:$4 sm:$0xff]   ;;  %v1249_v3 = vld [vmem:[%s1739_s1 + $0x2d8] ss:$24 sps:$4 sm:$0xff]   ;;  %v24_v4 = vld [vmem:[%s1740_s0] sm:$0xff] }
  0x17   :  { %615 = vmatpush1.bf16.msra.mxu0 %v1188_v23  ;;  %v1252_v5 = vld [vmem:[%s1739_s1 + $0x14] ss:$24 sps:$4 sm:$0xff]   ;;  %v1567_v8 = vpack.c.bf16 %v24_v4, %v24_v4  ;;  %v1250_v9 = vld [vmem:[%s1739_s1 + $0x10] ss:$24 sps:$4 sm:$0xff]   ;;  %v1258_v11 = vld [vmem:[%s1739_s1 + $0x44] ss:$24 sps:$4 sm:$0xff]  }
  0x18   :  { %656 = vmatpush1.bf16.msra.mxu1 %v1189_v24  ;;  %616 = vmatprep.subr.bf16.mxu0 %v1190_v25  ;;  %v1255_v6 = vld [vmem:[%s1741_s4 + $0x4] ss:$8 sps:$4 sm:$0xff]   ;;  %v735_v7 = vld [vmem:[%s1741_s4 + $0x10] sm:$0xff]  ;;  %v1253_v10 = vld [vmem:[%s1741_s4] ss:$8 sps:$4 sm:$0xff]  }
  0x19   :  { %657 = vmatprep.subr.bf16.mxu1 %v1192_v26  ;;  %v1110_v12 = vcombine.high %v735_v7, %v735_v7  ;;  %v1109_v13 = vcombine.low %v735_v7, %v735_v7  ;;  %v1256_v14 = vld [vmem:[%s1739_s1 + $0x40] ss:$24 sps:$4 sm:$0xff]   ;;  %v728_v16 = vld [vmem:[%s1742_s2 + $0x8] sm:$0xff]  ;;  %v1266_v21 = vld [vmem:[%s1739_s1 + $0xa4] ss:$24 sps:$4 sm:$0xff]  }
  0x1a   :  { %v727_v15 = vld [vmem:[%s1742_s2] sm:$0xff]  ;;  %v1263_v18 = vld [vmem:[%s1739_s1 + $0x74] ss:$24 sps:$4 sm:$0xff]   ;;  %v1261_v20 = vld [vmem:[%s1739_s1 + $0x70] ss:$24 sps:$4 sm:$0xff]  }
  0x1b   :  { %617 = vmatpush1.bf16.msra.mxu0 %v1194_v27  ;;  %v760_v17 = vsel %vm758_vm0, %v1109_v13, 0  ;;  %v731_v19 = vpack.c.bf16 %v728_v16, %v727_v15  ;;  %v1264_v22 = vld [vmem:[%s1739_s1 + $0xa0] ss:$24 sps:$4 sm:$0xff]   ;;  %v729_v23 = vld [vmem:[%s1742_s2 + $0x10] sm:$0xff]  ;;  %v1302_v47 = vld [vmem:[%s1739_s1 + $0x2e4] ss:$24 sps:$4 sm:$0xff]  }
  0x1c   :  { %658 = vmatpush1.bf16.msra.mxu1 %v1195_v28  ;;  %618 = vmatprep.subr.bf16.mxu0 %v1196_v29  ;;  %v730_v24 = vld [vmem:[%s1742_s2 + $0x18] sm:$0xff]  ;;  %v1269_v25 = vld [vmem:[%s1739_s1 + $0xd4] ss:$24 sps:$4 sm:$0xff]   ;;  %v1267_v27 = vld [vmem:[%s1739_s1 + $0xd0] ss:$24 sps:$4 sm:$0xff]  }
  0x1d   :  { %659 = vmatprep.subr.bf16.mxu1 %v1198_v30  ;;  %v732_v26 = vpack.c.bf16 %v730_v24, %v729_v23  ;;  %v1270_v28 = vld [vmem:[%s1739_s1 + $0x100] ss:$24 sps:$4 sm:$0xff]   ;;  %v1275_v29 = vld [vmem:[%s1739_s1 + $0x134] ss:$24 sps:$4 sm:$0xff]   ;;  %v1273_v30 = vld [vmem:[%s1739_s1 + $0x130] ss:$24 sps:$4 sm:$0xff]  }
  0x1f   :  { %619 = vmatpush1.bf16.msra.mxu0 %v1200_v31  ;;  %v1278_v31 = vld [vmem:[%s1739_s1 + $0x164] ss:$24 sps:$4 sm:$0xff]  }
  0x20   :  { %660 = vmatpush1.bf16.msra.mxu1 %v1201_v32  ;;  %620 = vmatprep.subr.bf16.mxu0 %v1202_v33  ;;  %v1276_v32 = vld [vmem:[%s1739_s1 + $0x160] ss:$24 sps:$4 sm:$0xff]   ;;  %v1281_v33 = vld [vmem:[%s1739_s1 + $0x194] ss:$24 sps:$4 sm:$0xff]  }
  0x21   :  { %661 = vmatprep.subr.bf16.mxu1 %v1204_v34  ;;  %v1279_v34 = vld [vmem:[%s1739_s1 + $0x190] ss:$24 sps:$4 sm:$0xff]  }
  0x23   :  { %621 = vmatpush1.bf16.msra.mxu0 %v1206_v35  ;;  %v1284_v35 = vld [vmem:[%s1739_s1 + $0x1c4] ss:$24 sps:$4 sm:$0xff]  }
  0x24   :  { %662 = vmatpush1.bf16.msra.mxu1 %v1207_v36  ;;  %622 = vmatprep.subr.bf16.mxu0 %v1208_v37  ;;  %v1282_v36 = vld [vmem:[%s1739_s1 + $0x1c0] ss:$24 sps:$4 sm:$0xff]   ;;  %v1287_v37 = vld [vmem:[%s1739_s1 + $0x1f4] ss:$24 sps:$4 sm:$0xff]  }
  0x25   :  { %663 = vmatprep.subr.bf16.mxu1 %v1210_v38  ;;  %v1285_v38 = vld [vmem:[%s1739_s1 + $0x1f0] ss:$24 sps:$4 sm:$0xff]  }
  0x27   :  { %623 = vmatpush1.bf16.msra.mxu0 %v1212_v39  ;;  %v1290_v39 = vld [vmem:[%s1739_s1 + $0x224] ss:$24 sps:$4 sm:$0xff]  }
  0x28   :  { %664 = vmatpush1.bf16.msra.mxu1 %v1213_v40  ;;  %624 = vmatprep.subr.bf16.mxu0 %v1214_v41  ;;  %v1288_v40 = vld [vmem:[%s1739_s1 + $0x220] ss:$24 sps:$4 sm:$0xff]   ;;  %v1293_v41 = vld [vmem:[%s1739_s1 + $0x254] ss:$24 sps:$4 sm:$0xff]  }
  0x29   :  { %665 = vmatprep.subr.bf16.mxu1 %v1216_v42  ;;  %v1291_v42 = vld [vmem:[%s1739_s1 + $0x250] ss:$24 sps:$4 sm:$0xff]  }
  0x2b   :  { %625 = vmatpush1.bf16.msra.mxu0 %v1218_v43  ;;  %v1296_v43 = vld [vmem:[%s1739_s1 + $0x284] ss:$24 sps:$4 sm:$0xff]  }
  0x2c   :  { %666 = vmatpush1.bf16.msra.mxu1 %v1219_v44  ;;  %626 = vmatprep.subr.bf16.mxu0 %v1220_v45  ;;  %v1294_v44 = vld [vmem:[%s1739_s1 + $0x280] ss:$24 sps:$4 sm:$0xff]   ;;  %v1299_v45 = vld [vmem:[%s1739_s1 + $0x2b4] ss:$24 sps:$4 sm:$0xff]  }
  0x2d   :  { %667 = vmatprep.subr.bf16.mxu1 %v1222_v46  ;;  %v1297_v46 = vld [vmem:[%s1739_s1 + $0x2b0] ss:$24 sps:$4 sm:$0xff]  }
  0x2f   :  { %627 = vmatpush1.bf16.msra.mxu0 %v1224_v49  ;;  %v1303_v49 = vld [vmem:[%s1743_s5 + $0x40] sm:$0xff]  }
  0x30   :  { %668 = vmatpush1.bf16.msra.mxu1 %v1225_v50  ;;  %628 = vmatprep.subr.bf16.mxu0 %v1226_v51  ;;  %v1304_v50 = vld [vmem:[%s1743_s5] sm:$0xff]   ;;  %v1305_v51 = vld [vmem:[%s1743_s5 + $0x48] sm:$0xff]  }
  0x31   :  { %669 = vmatprep.subr.bf16.mxu1 %v1228_v52  ;;  %v1306_v52 = vld [vmem:[%s1743_s5 + $0x8] sm:$0xff]  }
  0x33   :  { %629 = vmatpush1.bf16.msra.mxu0 %v1230_v53  ;;  %v1307_v53 = vld [vmem:[%s1743_s5 + $0x50] sm:$0xff]  }
  0x34   :  { %670 = vmatpush1.bf16.msra.mxu1 %v1231_v54  ;;  %630 = vmatprep.subr.bf16.mxu0 %v1232_v55  ;;  %v1308_v54 = vld [vmem:[%s1743_s5 + $0x10] sm:$0xff]   ;;  %v1309_v55 = vld [vmem:[%s1743_s5 + $0x58] sm:$0xff]  }
  0x35   :  { %671 = vmatprep.subr.bf16.mxu1 %v1234_v56  ;;  %v1310_v56 = vld [vmem:[%s1743_s5 + $0x18] sm:$0xff]  }
  0x37   :  { %631 = vmatpush1.bf16.msra.mxu0 %v1236_v57  ;;  %v1311_v57 = vld [vmem:[%s1743_s5 + $0x60] sm:$0xff]  }
  0x38   :  { %672 = vmatpush1.bf16.msra.mxu1 %v1237_v58  ;;  %632 = vmatprep.subr.bf16.mxu0 %v1238_v59  ;;  %v1312_v58 = vld [vmem:[%s1743_s5 + $0x20] sm:$0xff]   ;;  %v1313_v59 = vld [vmem:[%s1743_s5 + $0x68] sm:$0xff]  }
  0x39   :  { %673 = vmatprep.subr.bf16.mxu1 %v1240_v60  ;;  %v1314_v60 = vld [vmem:[%s1743_s5 + $0x28] sm:$0xff]  }
  0x3b   :  { %633 = vmatpush1.bf16.msra.mxu0 %v1242_v61  ;;  %v1315_v61 = vld [vmem:[%s1743_s5 + $0x70] sm:$0xff]  }
  0x3c   :  { %674 = vmatpush1.bf16.msra.mxu1 %v1243_v62  ;;  %634 = vmatprep.subr.bf16.mxu0 %v1244_v63  ;;  %v1316_v62 = vld [vmem:[%s1743_s5 + $0x30] sm:$0xff]   ;;  %v1317_v63 = vld [vmem:[%s1743_s5 + $0x78] sm:$0xff]  }
  0x3d   :  { %675 = vmatprep.subr.bf16.mxu1 %v1246_v0  ;;  %v1318_v0 = vld [vmem:[%s1743_s5 + $0x38] sm:$0xff]  }
  0x3f   :  { %635 = vmatpush1.bf16.msra.mxu0 %v1248_v2  ;;  %v864_v2 = vld [vmem:[%s1744_s3] sm:$0xff] }
  0x40   :  { %676 = vmatpush1.bf16.msra.mxu1 %v1249_v3  ;;  %686 = vmatprep.subr.bf16.mxu0 %v1252_v5 }
  0x41   :  { %765 = vmatprep.subr.bf16.mxu1 %v1255_v6  ;;  %867 = vperm.xlu0 %1153, %v864_v2  }
  0x42   :  { %637 = vmatmul.mubr.bf16.vlgmr.msra.gmra.mrb[0].mxu0 %v1567_v8 }
  0x43   :  { %678 = vmatmul.mubr.bf16.vlgmr.msra.gmra.mrb[0].mxu1 %v1567_v8  ;;  %687 = vmatpush1.bf16.msra.mxu0 %v1250_v9 }
  0x44   :  { %766 = vmatpush1.bf16.msra.mxu1 %v1253_v10  ;;  %688 = vmatprep.subr.bf16.mxu0 %v1258_v11 }
  0x45   :  { %1111 = vmatprep.subr.msk.bf16.mxu1 %vm758_vm0, %v1110_v12  ;;  %797 = vmatprep.mubr.bf16.mxu1 %v1319_v1 }
  0x46   :  { %718 = vmatprep.mubr.bf16.mxu0 %v1497_v48  ;;  %v1300_v48 = vld [vmem:[%s1739_s1 + $0x2e0] ss:$24 sps:$4 sm:$0xff]  }
  0x47   :  { %689 = vmatpush1.bf16.msra.mxu0 %v1256_v14 }
  0x48   :  { %768 = vmatpush1.bf16.msra.mxu1 %v760_v17  ;;  %690 = vmatprep.subr.bf16.mxu0 %v1263_v18 }
  0x49   :  { %1130 = vmatprep.subr.bf16.mxu1 %v1303_v49 }
  0x4b   :  { %1112 = vmatmul.mubr.msk.bf16.vlgmr.msra.gmra.mrb[4].mxu1 %vm751_vm1, %v731_v19  ;;  %691 = vmatpush1.bf16.msra.mxu0 %v1261_v20 }
  0x4c   :  { %807 = vmatprep.mubr.bf16.mxu1 %v1319_v1  ;;  %692 = vmatprep.subr.bf16.mxu0 %v1266_v21  ;;  %v1272_v1 = vld [vmem:[%s1739_s1 + $0x104] ss:$24 sps:$4 sm:$0xff]  }
  0x4d   :  { %1131 = vmatpush3.bf16.msra.mxu1 %v1304_v50 }
  0x4e   :  { %1132 = vmatprep.subr.bf16.mxu1 %v1305_v51 }
  0x4f   :  { %693 = vmatpush1.bf16.msra.mxu0 %v1264_v22 }
  0x50   :  { %694 = vmatprep.subr.bf16.mxu0 %v1269_v25 }
  0x51   :  { %1133 = vmatpush3.bf16.msra.mxu1 %v1306_v52 }
  0x52   :  { %1134 = vmatprep.subr.bf16.mxu1 %v1307_v53 }
  0x53   :  { %1113 = vmatmul.mubr.msk.bf16.gmra.mrb[8].mxu1 %vm751_vm1, %v732_v26  ;;  %695 = vmatpush1.bf16.msra.mxu0 %v1267_v27 }
  0x54   :  { %696 = vmatprep.subr.bf16.mxu0 %v1272_v1 }
  0x55   :  { %1135 = vmatpush3.bf16.msra.mxu1 %v1308_v54 }
  0x56   :  { %1136 = vmatprep.subr.bf16.mxu1 %v1309_v55 }
  0x57   :  { %697 = vmatpush1.bf16.msra.mxu0 %v1270_v28 }
  0x58   :  { %698 = vmatprep.subr.bf16.mxu0 %v1275_v29 }
  0x59   :  { %1137 = vmatpush3.bf16.msra.mxu1 %v1310_v56 }
  0x5a   :  { %1138 = vmatprep.subr.bf16.mxu1 %v1311_v57 }
  0x5b   :  { %699 = vmatpush1.bf16.msra.mxu0 %v1273_v30 }
  0x5c   :  { %700 = vmatprep.subr.bf16.mxu0 %v1278_v31 }
  0x5d   :  { %1139 = vmatpush3.bf16.msra.mxu1 %v1312_v58 }
  0x5e   :  { %1140 = vmatprep.subr.bf16.mxu1 %v1313_v59 }
  0x5f   :  { %701 = vmatpush1.bf16.msra.mxu0 %v1276_v32 }
  0x60   :  { %702 = vmatprep.subr.bf16.mxu0 %v1281_v33 }
  0x61   :  { %1141 = vmatpush3.bf16.msra.mxu1 %v1314_v60 }
  0x62   :  { %1142 = vmatprep.subr.bf16.mxu1 %v1315_v61 }
  0x63   :  { %703 = vmatpush1.bf16.msra.mxu0 %v1279_v34 }
  0x64   :  { %704 = vmatprep.subr.bf16.mxu0 %v1284_v35 }
  0x65   :  { %1143 = vmatpush3.bf16.msra.mxu1 %v1316_v62 }
  0x66   :  { %1144 = vmatprep.subr.bf16.mxu1 %v1317_v63 }
  0x67   :  { %705 = vmatpush1.bf16.msra.mxu0 %v1282_v36 }
  0x68   :  { %706 = vmatprep.subr.bf16.mxu0 %v1287_v37 }
  0x69   :  { %1145 = vmatpush3.bf16.msra.mxu1 %v1318_v0 }
  0x6b   :  { %707 = vmatpush1.bf16.msra.mxu0 %v1285_v38 }
  0x6c   :  { %708 = vmatprep.subr.bf16.mxu0 %v1290_v39 }
  0x6f   :  { %709 = vmatpush1.bf16.msra.mxu0 %v1288_v40 }
  0x70   :  { %710 = vmatprep.subr.bf16.mxu0 %v1293_v41 }
  0x73   :  { %711 = vmatpush1.bf16.msra.mxu0 %v1291_v42 }
  0x74   :  { %712 = vmatprep.subr.bf16.mxu0 %v1296_v43 }
  0x77   :  { %713 = vmatpush1.bf16.msra.mxu0 %v1294_v44 }
  0x78   :  { %714 = vmatprep.subr.bf16.mxu0 %v1299_v45 }
  0x7b   :  { %715 = vmatpush1.bf16.msra.mxu0 %v1297_v46 }
  0x7c   :  { %716 = vmatprep.subr.bf16.mxu0 %v1302_v47 }
  0x7f   :  { %717 = vmatpush1.bf16.msra.mxu0 %v1300_v48 }
  0x82   :  { %719 = vmatmul.mubr.bf16.vlgmr.msra.gmra.mrb[4].mxu0 %v1567_v8 }
  0xc0   :  { %v868_v38 = vpop.permute.xlu0 %867 }
 0x115   :  { %v638_v3 = vpop.f32.mrb[0].mxu0 }
 0x116   :  { %v679_v4 = vpop.f32.mrb[0].mxu1  ;;  %v640_v5 = vpop.f32.mrb[1].mxu0 }
 0x117   :  { %v681_v6 = vpop.f32.mrb[1].mxu1  ;;  %v642_v7 = vpop.f32.mrb[2].mxu0 }
 0x118   :  { %v683_v8 = vpop.f32.mrb[2].mxu1  ;;  %v643_v9 = vpop.f32.mrb[3].mxu0 }
 0x119   :  { %v684_v10 = vpop.f32.mrb[3].mxu1 }
 0x11e   :  { %v799_v11 = vpop.f32.mrb[4].mxu1 }
 0x11f   :  { %v818_v12 = vmul.f32 %v799_v11, %v638_v3  ;;  %v801_v13 = vpop.f32.mrb[5].mxu1 }
 0x120   :  { %v819_v14 = vmul.f32 %v801_v13, %v640_v5  ;;  %v803_v15 = vpop.f32.mrb[6].mxu1 }
 0x121   :  { %v820_v16 = vmul.f32 %v803_v15, %v679_v4  ;;  %v805_v17 = vpop.f32.mrb[7].mxu1 }
 0x122   :  { %v821_v18 = vmul.f32 %v805_v17, %v681_v6 }
 0x123   :  { %v822_v19 = vadd.f32 %v820_v16, %v818_v12 }
 0x124   :  { %v823_v20 = vadd.f32 %v821_v18, %v819_v14 }
 0x126   :  { %v809_v21 = vpop.f32.mrb[8].mxu1 }
 0x127   :  { %v811_v22 = vpop.f32.mrb[9].mxu1 }
 0x128   :  { %v813_v23 = vpop.f32.mrb[10].mxu1 }
 0x129   :  { %v815_v24 = vpop.f32.mrb[11].mxu1 }
 0x155   :  { %v720_v25 = vpop.f32.mrb[4].mxu0 }
 0x156   :  { %v824_v26 = vmul.f32 %v809_v21, %v720_v25  ;;  %v722_v27 = vpop.f32.mrb[5].mxu0 }
 0x157   :  { %v825_v1 = vmul.f32 %v811_v22, %v722_v27  ;;  %v724_v28 = vpop.f32.mrb[6].mxu0 }
 0x158   :  { %v826_v29 = vadd.f32 %v824_v26, %v822_v19  ;;  %v725_v30 = vpop.f32.mrb[7].mxu0 }
 0x159   :  { %v827_v31 = vadd.f32 %v825_v1, %v823_v20 }
 0x15a   :  { %v828_v32 = vadd.f32 %v826_v29, %v813_v23 }
 0x15b   :  { %v829_v33 = vadd.f32 %v827_v31, %v815_v24 }
 0x15c   :  { %v830_v35 = vpack.c.bf16 %v828_v32, %v828_v32 }
 0x15d   :  { %v831_v34 = vpack.c.bf16 %v829_v33, %v829_v33 }
 0x15f   :  { %998 = vmatprep.mubr.bf16.mxu1 %v831_v34 }
 0x160   :  { %999 = vmatmul.mubr.bf16.vlgmr.msra.gmra.mrb[12].mxu1 %v830_v35 }
 0x233   :  { %v1146_v36 = vpop.f32.mrb[12].mxu1 }
 0x234   :  { %v1147_v37 = vpop.f32.mrb[13].mxu1 }
 0x235   :  { %v1148_v39 = vadd.f32 %v1147_v37, %v1146_v36  ;;  %v1149_v40 = vpop.f32.mrb[14].mxu1 }
 0x236   :  { %v1150_v41 = vpop.f32.mrb[15].mxu1 }
 0x237   :  { %v1001_v42 = vadd.f32 %v1148_v39, %v868_v38 }
 0x239   :  { %1006 = vst [vmem:[%s1745_s6] sm:$0xff] %v1001_v42 }

</bundles_post_ra>
